<compile_context>
chip_gen: v6e
topology: v6e:2x2x1
jax: 0.10.0
libtpu: 0.0.40
codegen_flags: <defaults>
</compile_context>

<pallas_src>
import jax
import jax.numpy as jnp
from jax.experimental import pallas as pl
from jax.experimental.pallas import tpu as pltpu

_MiB = 1024 * 1024
_LANE = 128


def _round_up(a, b):
    return (a + b - 1) // b * b


def _normalize_kernel(x_ref, o_ref):
    # x_ref / o_ref: (C, TILE_HW) block (batch dim squeezed away).
    x = x_ref[...]
    xf = x.astype(jnp.float32)
    sq_sum = jnp.sum(xf * xf, axis=0, keepdims=True)       # (1, TILE_HW), f32 accum
    qn = jnp.sqrt(sq_sum) + 1e-12                           # matches torch.norm(...)+1e-12
    inv = pl.reciprocal(qn, approx=False)                   # exact; keeps 1e-6 agreement
    # Multiply in the input dtype: avoids a full-tile f32 product temporary.
    o_ref[...] = (x * inv.astype(x.dtype)).astype(o_ref.dtype)


def _vmem_budgets():
    """(per-step buffer budget, vmem_limit_bytes), generation-aware."""
    cap = None
    try:
        cap = int(pltpu.get_tpu_info().vmem_capacity_bytes)
    except Exception:
        cap = None
    if cap is None:
        # Unknown chip: conservative, safe everywhere (incl. 64 MiB v7x VMEM).
        return 16 * _MiB, 44 * _MiB
    if cap <= 80 * _MiB:
        # v7x-class: 64 MiB physical VMEM, ~3.2 TB/s HBM -> want big steps, but
        # keep well under 64 MiB with headroom for Pallas internals.
        return 20 * _MiB, 44 * _MiB
    # v5e / v6e: 128 MiB physical VMEM. Explicit limit is what lets big tiles
    # compile on v5e (16 MiB scoped default).
    return 16 * _MiB, 64 * _MiB


def _pick_tile_hw(C, hw_pad, itemsize, n_spatial_min, budget):
    """Largest lane-dense spatial tile whose pipelined working set fits `budget`."""
    itemsize = int(itemsize)
    sub = max(8, 32 // max(itemsize, 1))     # sublanes per packed vreg row for dtype
    c_io = _round_up(C, sub)                 # sublane-padded C of in/out VMEM tiles
    c_f32 = _round_up(C, 8)                  # f32 upcast temporary
    # Per lane of tile_hw: 2 double-buffered input tiles + 2 output tiles (native
    # dtype) + 1 full f32 upcast temp + small (1, tile) f32 row temporaries.
    per_lane = 4 * c_io * itemsize + c_f32 * 4 + 16
    tile = (budget // per_lane) // _LANE * _LANE
    tile = max(tile, _LANE)
    tile = min(tile, hw_pad)
    if n_spatial_min > 1:
        # Keep >= n_spatial_min spatial tiles so both v7x TensorCores get work.
        cap = (hw_pad // n_spatial_min) // _LANE * _LANE
        if cap >= _LANE:
            tile = min(tile, cap)
    return tile


def normalize(x):
    """x: (N, C, H, W). Returns x / (||x||_2 over C + 1e-12)."""
    N, C, H, W = x.shape
    HW = H * W
    x_flat = x.reshape(N, C, HW)

    # Keep the lane dim a multiple of 128 (zero-pad; zeros can never NaN and the
    # C-reduction means padded lanes cannot contaminate real outputs).
    hw_pad = _round_up(HW, _LANE)
    if hw_pad != HW:
        x_flat = jnp.pad(x_flat, ((0, 0), (0, 0), (0, hw_pad - HW)))

    budget, vmem_limit = _vmem_budgets()
    n_spatial_min = 2 if N < 2 else 1
    tile_hw = _pick_tile_hw(C, hw_pad, x.dtype.itemsize, n_spatial_min, budget)

    grid = (N, pl.cdiv(hw_pad, tile_hw))
    block = (pl.Squeezed(), C, tile_hw)
    spec = pl.BlockSpec(block, lambda n, s: (n, 0, s))

    cost = pl.CostEstimate(
        flops=3 * N * C * HW,
        transcendentals=2 * N * HW,                         # sqrt + reciprocal
        bytes_accessed=2 * N * C * HW * x.dtype.itemsize,
    )

    out_flat = pl.pallas_call(
        _normalize_kernel,
        out_shape=jax.ShapeDtypeStruct((N, C, hw_pad), x.dtype),
        grid_spec=pltpu.PrefetchScalarGridSpec(
            num_scalar_prefetch=0,
            grid=grid,
            in_specs=[spec],
            out_specs=spec,
        ),
        compiler_params=pltpu.CompilerParams(
            dimension_semantics=("parallel", "parallel"),
            vmem_limit_bytes=vmem_limit,
        ),
        cost_estimate=cost,
    )(x_flat)

    if hw_pad != HW:
        out_flat = out_flat[:, :, :HW]
    return out_flat.reshape(N, C, H, W)


def _reference(x):
    qn = jnp.sqrt(jnp.sum(x.astype(jnp.float32) ** 2, axis=1, keepdims=True)) + 1e-12
    return (x / qn).astype(x.dtype)


if __name__ == "__main__":
    key = jax.random.PRNGKey(0)

    # Main check: small NCHW shape consistent with the module.
    x = jax.random.normal(key, (2, 4, 16, 16), dtype=jnp.float32)
    out = jax.block_until_ready(normalize(x))
    ref = _reference(x)
    assert out.shape == x.shape
    assert jnp.allclose(out, ref, atol=1e-6, rtol=1e-6)

    # Secondary check: exercises the HW-not-multiple-of-128 (padded) path and
    # the N=1 "keep two spatial tiles" logic.
    x2 = jax.random.normal(jax.random.PRNGKey(1), (1, 3, 7, 9), dtype=jnp.float32)
    out2 = jax.block_until_ready(normalize(x2))
    assert jnp.allclose(out2, _reference(x2), atol=1e-6, rtol=1e-6)

    print("KERNEL_OK")
</pallas_src>

<mosaic_0001>
module attributes {stable_mosaic.version = 11 : i64} {
  func.func @_normalize_kernel(%arg0: i32, %arg1: i32, %arg2: memref<1x4x256xf32, #tpu.memory_space<vmem>>, %arg3: memref<1x4x256xf32, #tpu.memory_space<vmem>>) attributes {dimension_semantics = [#tpu.dimension_semantics<parallel>, #tpu.dimension_semantics<parallel>], iteration_bounds = array<i64: 2, 1>, scalar_prefetch = 0 : i64, scratch_operands = 0 : i64, tpu.core_type = #tpu.core_type<tc>, window_params = [{transform_indices = @transform_0, window_bounds = array<i64: 1, 4, 256>}, {transform_indices = @transform_1, window_bounds = array<i64: 1, 4, 256>}]} {
    %c0 = arith.constant 0 : index
    %c0_0 = arith.constant 0 : index
    %c0_1 = arith.constant 0 : index
    %0 = vector.load %arg2[%c0, %c0_0, %c0_1] : memref<1x4x256xf32, #tpu.memory_space<vmem>>, vector<1x4x256xf32>
    %1 = vector.shape_cast %0 : vector<1x4x256xf32> to vector<4x256xf32>
    %2 = arith.mulf %1, %1 : vector<4x256xf32>
    %cst = arith.constant dense<0.000000e+00> : vector<256xf32>
    %3 = vector.multi_reduction <add>, %2, %cst [0] : vector<4x256xf32> to vector<256xf32>
    %4 = vector.shape_cast %3 : vector<256xf32> to vector<1x256xf32>
    %5 = math.sqrt %4 : vector<1x256xf32>
    %cst_2 = arith.constant 9.99999996E-13 : f32
    %6 = vector.broadcast %cst_2 : f32 to vector<1x256xf32>
    %7 = arith.addf %5, %6 : vector<1x256xf32>
    %8 = tpu.reciprocal %7 : vector<1x256xf32> -> vector<1x256xf32>
    %9 = vector.broadcast %8 : vector<1x256xf32> to vector<4x256xf32>
    %10 = arith.mulf %1, %9 : vector<4x256xf32>
    %c0_3 = arith.constant 0 : index
    %c0_4 = arith.constant 0 : index
    %c0_5 = arith.constant 0 : index
    %11 = vector.load %arg3[%c0_3, %c0_4, %c0_5] : memref<1x4x256xf32, #tpu.memory_space<vmem>>, vector<1x4x256xf32>
    %12 = vector.shape_cast %11 : vector<1x4x256xf32> to vector<4x256xf32>
    %13 = vector.shape_cast %10 : vector<4x256xf32> to vector<1x4x256xf32>
    tpu.vector_store %arg3[%c0_3, %c0_4, %c0_5], %13 {strides = array<i32>} : memref<1x4x256xf32, #tpu.memory_space<vmem>>, vector<1x4x256xf32>,
    return
  }
  func.func @transform_0(%arg0: i32, %arg1: i32) -> (i32, i32, i32) {
    %c0_i32 = arith.constant 0 : i32
    %c0_i32_0 = arith.constant 0 : i32
    return %arg0, %c0_i32, %arg1 : i32, i32, i32
  }
  func.func @transform_1(%arg0: i32, %arg1: i32) -> (i32, i32, i32) {
    %c0_i32 = arith.constant 0 : i32
    %c0_i32_0 = arith.constant 0 : i32
    return %arg0, %c0_i32, %arg1 : i32, i32, i32
  }
}

</mosaic_0001>

<bundles_post_ra>
// kernel: tpu_custom_call.1
= control target key start
LH: loop header
LB: loop body
LE: loop exit
PB: predicated region body
PF: predicated region fallthrough
CT: control target
= control target key end

     0   :  { %6 = vsyncpa [#allocation3], 0  ;;  %s645_s0 = inlined_call_operand.hbm [shape: f32[2,4,256], index: 0, kind: input, shape index: {}]   ;;  %s646_s1 = inlined_call_operand.hbm [shape: f32[2,4,256], index: 1, kind: output, shape index: {}]  }
   0x1   :  { %8 = vsyncpa [#allocation3 + $0x1], 0 }
   0x2   :  { %9 = vsyncpa [#allocation4], 0 }
   0x3   :  { %11 = vsyncpa [#allocation4 + $0x1], 0  ;;  %s507_s6 = smov 0   ;;  %s509_s7 = smov 0  }
   0x4   :  { %s511_s8 = smov 0   ;;  %s513_s9 = smov 0  }
   0x5   :  { %s515_s10 = smov 0   ;;  %s517_s11 = smov 0  }
   0x6 LB: > { %s298_s12 = sadd.s32 4294967295, %s493_s11   ;;  %s299_s13 = sadd.s32 4294967294, %s493_s11   ;;  %s493_s11 = sphi %s517_s11, %s17_s11   ;;  %s489_s10 = sphi %s515_s10, %s658_s10   ;;  %s485_s9 = sphi %s513_s9, %s657_s9   ;;  %s481_s8 = sphi %s511_s8, %s656_s8   ;;  %s477_s7 = sphi %s509_s7, %s655_s7   ;;  %s473_s6 = sphi %s507_s6, %s654_s6  }
   0x7   : > { %s29_s14 = sadd.s32 1, %s489_s10  ;;  %s38_s15 = sadd.s32 1, %s481_s8 }
   0x8   : > { %p31_p0 = scmp.ge.s32.totalorder %s29_s14, 2  ;;  %p45_p1 = scmp.ne.s32.totalorder %s481_s8, %s477_s7 }
   0x9   : > { %p46_p2 = scmp.eq.s32.totalorder %s493_s11, 0  ;;  %p51_p3 = scmp.ne.s32.totalorder %s477_s7, %s473_s6 }
   0xa   : > { %s660_s14 = smov (%p31_p0, %s29_s14), 0  ;;  %p52_p5 = scmp.eq.s32.totalorder %s298_s12, 0 }
   0xb   : > { %p548_p4 = por %p46_p2, %p45_p1  ;;  %s33_s17 = ssub.s32 %s489_s10, %s660_s14 }
   0xc   : > { %p77_p6 = scmp.eq.s32.totalorder %s298_s12, 1  ;;  %p36_p7 = scmp.eq.s32.totalorder %s33_s17, 0 }
   0xd   : > { %p554_p8 = por %p52_p5, %p51_p3  ;;  %p83_p10 = scmp.eq.s32.totalorder %s299_s13, 1 }
   0xe   : > { %p558_p9 = por %p77_p6, %p45_p1  ;;  %p327_p13 = scmp.lt.s32.totalorder %s493_s11, 2 }
   0xf   : > { %s563_s20 = scalar_select %p36_p7, %s481_s8, %s38_s15  }
  0x10   : > { %p565_p11 = por %p83_p10, %p51_p3  ;;  %s103_s22 = sand.u32 1, %s481_s8  }
  0x11   : > { %s302_s23 = sshll.u32 %s103_s22, 3  ;;  %s313_s24 = sshll.u32 %s489_s10, 7 }
  0x12   : > { %s650_s21 = scalar_select %p565_p11, 1, 0 }
  0x13   : > { %s115_s27 = scalar_lea.hbm %s645_s0, %s313_s24  ;;  %s107_s28 = scalar_lea.vmem [#allocation2], %s302_s23 }
  0x14   : > { %s117_s29 = sshll.u32 %s107_s28, 4  ;;  %p578_p0 = pnand %p327_p13, %p548_p4  ;;  %s118_s29 = int_to_ptr.vmem [resolvable:$true] %s117_s29 }
  0x15   : > { %p305_p1 = scmp.ge.s32.totalorder %s493_s11, 1  ;;  %p122_p2 = scmp.lt.s32.totalorder %s493_s11, 3 }
  0x16   : > { %s104_s2 = scalar_lea.sflag [#allocation3], %s103_s22  ;;  %p387_p3 = pneg %p578_p0 }
  0x17   : > { %s398_s3 = scalar_lea.vmem %s118_s29, 128  ;;  %s495_s4 = smov [#allocation2]  }
  0x18   : > { %p399_p5 = scmp.ne.s32.totalorder %s118_s29, %s398_s3  ;;  %s403_s5 = sshll.u32 %s495_s4, 4  ;;  %s404_s5 = int_to_ptr.vmem [resolvable:$false] %s403_s5 }
  0x19   : > { %s405_s12 = scalar_lea.vmem %s404_s5, 256  ;;  %p406_p10 = scmp.lt.s32.totalorder %s118_s29, %s404_s5 }
  0x1a   : > { %p401_p6 = pnand %p399_p5, %p387_p3  ;;  %p407_p12 = scmp.lt.s32.totalorder %s405_s12, %s398_s3 }
  0x1c   : > { %p402_p7 = pneg %p401_p6  ;;  %p408_p4 = por %p407_p12, %p406_p10 }
  0x1e   : > { %p409_p13 = pnand %p408_p4, %p402_p7 }
  0x20   : > { %412 = shalt.err (!%p409_p13)
}
  0x21   : > { %322 = dma.hbm_to_vmem [thread:$0]  (!%p578_p0), %s115_s27, 128, %s118_s29, %s104_s2  }
  0x22   : > { %p123_p11 = pnand %p305_p1, %p122_p2 }
  0x23   : > { %s593_s13 = sand.u32 (!%p123_p11), 1, %s477_s7  }
  0x24   : > { %126 = sbr.rel (%p123_p11) target bundleno = 111 (0x6f), region = 24  ;;  %s306_s15 = sshll.u32 (!%p123_p11), %s593_s13, 3 }
  0x25   : > { %s129_s16 = scalar_lea.sflag (!%p123_p11), [#allocation3], %s593_s13  ;;  %s132_s17 = scalar_lea.vmem (!%p123_p11), [#allocation2], %s306_s15 }
  0x29   : > { %464 = dma.done.wait (%p554_p8), %s129_s16, 128  }
  0x2a   : > { %466 = vsyncadd (%p554_p8), %s129_s16, 4294967168  ;;  %v153_v0 = vld [vmem:[%s132_s17] sm:$0xff]  ;;  %vm158_vm0 = vcmask 1043456   ;;  %s150_s18 = scalar_lea.vmem [#allocation5], %s306_s15  ;;  %s314_s23 = sshll.u32 %s485_s9, 7 }
  0x2b   : > { %v154_v1 = vmul.f32 %v153_v0, %v153_v0  ;;  %s214_s22 = sshll.u32 %s150_s18, 4  ;;  %s212_s26 = scalar_lea.hbm %s646_s1, %s314_s23  ;;  %s215_s22 = int_to_ptr.vmem [resolvable:$true] %s214_s22 }
  0x2c   : > { %s198_s27 = scalar_lea.sflag [#allocation4], %s593_s13  ;;  %s413_s28 = scalar_lea.vmem %s215_s22, 128 }
  0x2d   : > { %v156_v2 = vcombine.high %v154_v1, %v154_v1  ;;  %v159_v3 = vsel %vm158_vm0, %v154_v1, 0.0  ;;  %p414_p8 = scmp.ne.s32.totalorder %s215_s22, %s413_s28  ;;  %s496_s29 = smov [#allocation5]  }
  0x2e   : > { %v160_v4 = vrot.slane %v159_v3, 4  ;;  %s417_s30 = sshll.u32 %s496_s29, 4  ;;  %s418_s30 = int_to_ptr.vmem [resolvable:$false] %s417_s30 }
  0x2f   : > { %v166_v5 = vsel %vm158_vm0, %v156_v2, 0.0  ;;  %p415_p11 = pnand %p414_p8, %p558_p9  ;;  %s419_s2 = scalar_lea.vmem %s418_s30, 256 }
  0x30   : > { %v161_v6 = vadd.f32 %v160_v4, %v159_v3  ;;  %v167_v7 = vrot.slane %v166_v5, 4  ;;  %p420_p0 = scmp.lt.s32.totalorder %s215_s22, %s418_s30  ;;  %p421_p1 = scmp.lt.s32.totalorder %s419_s2, %s413_s28 }
  0x31   : > { %p416_p12 = pneg %p415_p11 }
  0x32   : > { %v162_v8 = vrot.slane %v161_v6, 2  ;;  %v168_v9 = vadd.f32 %v167_v7, %v166_v5  ;;  %p422_p2 = por %p421_p1, %p420_p0 }
  0x34   : > { %v163_v10 = vadd.f32 %v162_v8, %v161_v6  ;;  %v169_v11 = vrot.slane %v168_v9, 2  ;;  %p423_p3 = pnand %p422_p2, %p416_p12 }
  0x36   : > { %v164_v12 = vrot.slane %v163_v10, 1  ;;  %v170_v13 = vadd.f32 %v169_v11, %v168_v9 }
  0x38   : > { %v165_v14 = vadd.f32 %v164_v12, %v163_v10  ;;  %v171_v15 = vrot.slane %v170_v13, 1 }
  0x3a   : > { %v172_v16 = vadd.f32 %v171_v15, %v170_v13  ;;  %377 = vrsqrt.f32 %v165_v14  ;;  %vm175_vm1 = vcmp.eq.f32.partialorder %v165_v14, inf  ;;  %v178_v18 = vand.u32 2147483648, %v165_v14 }
  0x3b   : > { %vm177_vm2 = vcmp.eq.f32.partialorder %v165_v14, 0.0 }
  0x3c   : > { %379 = vrsqrt.f32 %v172_v16  ;;  %vm182_vm3 = vcmp.eq.f32.partialorder %v172_v16, inf  ;;  %v185_v21 = vand.u32 2147483648, %v172_v16  ;;  %vm184_vm4 = vcmp.eq.f32.partialorder %v172_v16, 0.0 }
  0x47   : > { %v378_v17 = vpop.eup %377 }
  0x48   : > { %v174_v19 = vmul.f32 %v378_v17, %v165_v14 }
  0x49   : > { %v380_v20 = vpop.eup %379 }
  0x4a   : > { %v176_v22 = vsel %vm175_vm1, %v165_v14, %v174_v19  ;;  %v181_v23 = vmul.f32 %v380_v20, %v172_v16 }
  0x4b   : > { %v179_v24 = vsel %vm177_vm2, %v178_v18, %v176_v22 }
  0x4c   : > { %v183_v25 = vsel %vm182_vm3, %v172_v16, %v181_v23  ;;  %v187_v26 = vadd.f32 1e-12, %v179_v24 }
  0x4d   : > { %v186_v27 = vsel %vm184_vm4, %v185_v21, %v183_v25 }
  0x4e   : > { %v188_v28 = vadd.f32 1e-12, %v186_v27  ;;  %381 = vrcp.f32 %v187_v26 }
  0x50   : > { %383 = vrcp.f32 %v188_v28 }
  0x5b   : > { %v382_v29 = vpop.eup %381 }
  0x5d   : > { %v384_v30 = vpop.eup %383 }
  0x5e   : > { %v193_v31 = vcombine.low %v382_v29, %v384_v30 }
  0x60   : > { %v195_v32 = vmul.f32 %v193_v31, %v153_v0 }
  0x62   : > { %196 = vst [vmem:[%s150_s18] sm:$0xff] %v195_v32 }
  0x63   : > { %426 = shalt.err (!%p423_p3)
}
  0x64   : > { %s427_s9 = scalar_lea.hbm %s212_s26, 128  ;;  %s431_s5 = scalar_lea.hbm %s646_s1, 256 }
  0x65   : > { %p428_p5 = scmp.ne.s32.totalorder %s212_s26, %s427_s9  ;;  %p432_p10 = scmp.lt.s32.totalorder %s212_s26, %s646_s1 }
  0x66   : > { %p433_p4 = scmp.lt.s32.totalorder %s431_s5, %s427_s9 }
  0x67   : > { %p429_p6 = pnand %p428_p5, %p558_p9 }
  0x68   : > { %p434_p13 = por %p433_p4, %p432_p10 }
  0x69   : > { %p430_p7 = pneg %p429_p6 }
  0x6b   : > { %p435_p8 = pnand %p434_p13, %p430_p7 }
  0x6d   : > { %438 = shalt.err (!%p435_p8)
}
  0x6e   : > { %317 = dma.vmem_to_hbm [thread:$0]  (%p558_p9), %s215_s22, 128, %s212_s26, %s198_s27  }
  0x6f PF: > { %s226_s15 = sand.u32 1, %s473_s6   ;;  %p652_p11 = scmp.ne.s32.totalorder %s650_s21, 0 }
  0x70   : > { %p653_p12 = scmp.ge.s32.totalorder %s493_s11, 2  ;;  %s227_s16 = scalar_lea.sflag [#allocation4], %s226_s15 }
  0x72   : > { %p324_p0 = pnand %p653_p12, %p652_p11 }
  0x74   : > { %p325_p1 = pneg %p324_p0 }
  0x76   : > { %468 = dma.done.wait (%p325_p1), %s227_s16, 128  }
  0x77   : > { %470 = vsyncadd (%p325_p1), %s227_s16, 4294967168  ;;  %s17_s11 = sadd.s32 1, %s493_s11   ;;  %s654_s6 = smov %s477_s7 }
  0x78   : > { %p14_p2 = scmp.ge.s32.totalorder %s17_s11, 4   ;;  %s655_s7 = smov %s481_s8 }
  0x79   : > { %s656_s8 = smov %s563_s20  ;;  %s657_s9 = smov %s489_s10 }
  0x7a   : > { %s658_s10 = smov %s660_s14  ;;  %16 = sbr.rel (!%p14_p2) target bundleno = 6 (0x6), region = 69 }
  0x7f   :  { %232 = vsyncpa [#allocation3], 1 }
  0x80   :  { %234 = vsyncpa [#allocation3 + $0x1], 1 }
  0x81   :  { %235 = vsyncpa [#allocation4], 1 }
  0x82   :  { %237 = vsyncpa [#allocation4 + $0x1], 1 }

</bundles_post_ra>
